<compile_context>
chip_gen: v6e
topology: v6e:2x2x1
jax: 0.10.0
libtpu: 0.0.40
codegen_flags: <defaults>
</compile_context>

<pallas_src>
import functools

import jax
import jax.numpy as jnp
from jax import lax
from jax.experimental import pallas as pl
from jax.experimental.pallas import tpu as pltpu


# Contract x:(M, K) against w:(N, K) on K -> (M, N); transpose folded into the
# MXU op instead of materialized in HBM.
_CONTRACT_ON_K = (((1,), (1,)), ((), ()))
_BN_EPS = 1e-5


def _dot_nt(x, w):
    return lax.dot_general(
        x, w, dimension_numbers=_CONTRACT_ON_K,
        preferred_element_type=jnp.float32)


def _round_up(a, b):
    return ((a + b - 1) // b) * b


# --------------------------------------------------------------------------
# Small path: full arrays in VMEM, no grid (launch overhead dominates here).
# --------------------------------------------------------------------------

def _small_kernel(x_ref, w_ref, o_ref):
    o_ref[...] = _dot_nt(x_ref[...], w_ref[...]).astype(o_ref.dtype)


def _small_bias_kernel(x_ref, w_ref, b_ref, o_ref):
    y = _dot_nt(x_ref[...], w_ref[...]) + b_ref[...]
    o_ref[...] = y.astype(o_ref.dtype)


def _small_bn_kernel(x_ref, w_ref, o_ref):
    # BatchNorm1d (training mode, gamma=1, beta=0, eps=1e-5, biased variance).
    # The whole batch is resident in this single block so batch-axis stats are
    # exact. rsqrt hits the EUP slot (free relative to the matmul).
    y = _dot_nt(x_ref[...], w_ref[...])
    mean = jnp.mean(y, axis=0, keepdims=True)
    centered = y - mean
    var = jnp.mean(centered * centered, axis=0, keepdims=True)
    o_ref[...] = (centered * lax.rsqrt(var + _BN_EPS)).astype(o_ref.dtype)


def _small_forward(x, weight, bias, *, use_bn):
    B, _ = x.shape
    N = weight.shape[0]
    out_shape = jax.ShapeDtypeStruct((B, N), x.dtype)
    vspec = lambda: pl.BlockSpec(memory_space=pltpu.MemorySpace.VMEM)

    if use_bn:
        return pl.pallas_call(
            _small_bn_kernel, out_shape=out_shape,
            in_specs=[vspec(), vspec()], out_specs=vspec(),
        )(x, weight)

    if bias is not None:
        return pl.pallas_call(
            _small_bias_kernel, out_shape=out_shape,
            in_specs=[vspec(), vspec(), vspec()], out_specs=vspec(),
        )(x, weight, bias.reshape(1, N))

    return pl.pallas_call(
        _small_kernel, out_shape=out_shape,
        in_specs=[vspec(), vspec()], out_specs=vspec(),
    )(x, weight)


# --------------------------------------------------------------------------
# Tiled linear path: (M, N, K) grid, f32 VMEM accumulator, double buffering.
# --------------------------------------------------------------------------

def _tiled_kernel(x_ref, w_ref, o_ref, acc_ref):
    @pl.when(pl.program_id(2) == 0)
    def _():
        acc_ref[...] = jnp.zeros_like(acc_ref)

    acc_ref[...] += _dot_nt(x_ref[...], w_ref[...])

    @pl.when(pl.program_id(2) == pl.num_programs(2) - 1)
    def _():
        o_ref[...] = acc_ref[...].astype(o_ref.dtype)


def _tiled_bias_kernel(x_ref, w_ref, b_ref, o_ref, acc_ref):
    @pl.when(pl.program_id(2) == 0)
    def _():
        acc_ref[...] = jnp.zeros_like(acc_ref)

    acc_ref[...] += _dot_nt(x_ref[...], w_ref[...])

    @pl.when(pl.program_id(2) == pl.num_programs(2) - 1)
    def _():
        o_ref[...] = (acc_ref[...] + b_ref[...]).astype(o_ref.dtype)


def _tiled_forward(x, weight, bias, *, tm=256, tn=256, tk=512):
    B, K = x.shape
    N = weight.shape[0]
    dtype = x.dtype
    itemsize = jnp.dtype(dtype).itemsize

    # Clamp tiles to the (padded) problem; keep N tiles multiples of 128 for
    # lane-dense stores and M/N tiles 256 where possible (v6e/v7x MXU).
    tm = min(tm, _round_up(B, 8))
    tn = min(tn, _round_up(N, 128))
    tk = min(tk, _round_up(K, 128))

    Mp, Np, Kp = _round_up(B, tm), _round_up(N, tn), _round_up(K, tk)

    xp = x if (Mp == B and Kp == K) else jnp.pad(x, ((0, Mp - B), (0, Kp - K)))
    wp = (weight if (Np == N and Kp == K)
          else jnp.pad(weight, ((0, Np - N), (0, Kp - K))))

    grid = (Mp // tm, Np // tn, Kp // tk)

    # VMEM budget: double-buffered input tiles + double-buffered output tile
    # + f32 accumulator, with 2x headroom (fits v7x's smaller VMEM).
    tile_bytes = (2 * (tm * tk + tn * tk) * itemsize
                  + 2 * tm * tn * itemsize
                  + tm * tn * 4)
    vmem_limit = min(max(2 * tile_bytes, 16 * 1024 * 1024), 48 * 1024 * 1024)

    in_specs = [
        pl.BlockSpec((tm, tk), lambda i, j, k: (i, k)),
        pl.BlockSpec((tn, tk), lambda i, j, k: (j, k)),  # transpose via dot dims
    ]
    args = [xp, wp]
    if bias is not None:
        bp = bias if Np == N else jnp.pad(bias, (0, Np - N))
        in_specs.append(pl.BlockSpec((1, tn), lambda i, j, k: (0, j)))
        args.append(bp.reshape(1, Np))
        kernel = _tiled_bias_kernel
    else:
        kernel = _tiled_kernel

    out = pl.pallas_call(
        kernel,
        out_shape=jax.ShapeDtypeStruct((Mp, Np), dtype),
        grid_spec=pltpu.PrefetchScalarGridSpec(
            num_scalar_prefetch=0,
            grid=grid,
            in_specs=in_specs,
            out_specs=pl.BlockSpec((tm, tn), lambda i, j, k: (i, j)),
            scratch_shapes=[pltpu.VMEM((tm, tn), jnp.float32)],
        ),
        compiler_params=pltpu.CompilerParams(
            dimension_semantics=("parallel", "parallel", "arbitrary"),
            vmem_limit_bytes=vmem_limit),
    )(*args)

    return out[:B, :N] if (Mp != B or Np != N) else out


# --------------------------------------------------------------------------
# Fused BatchNorm path: grid (N, K), full-M column block. The accumulator
# holds the complete (M, tn) output column at the last K step, so exact batch
# stats + normalization happen in-kernel (single HBM pass of the activation).
# --------------------------------------------------------------------------

def _bn_fused_kernel(x_ref, w_ref, o_ref, acc_ref, *, n_valid_rows):
    @pl.when(pl.program_id(1) == 0)
    def _():
        acc_ref[...] = jnp.zeros_like(acc_ref)

    acc_ref[...] += _dot_nt(x_ref[...], w_ref[...])

    @pl.when(pl.program_id(1) == pl.num_programs(1) - 1)
    def _():
        y = acc_ref[...]
        inv_b = 1.0 / n_valid_rows
        # Rows >= n_valid_rows are zero-padded in x -> zero rows in y, so the
        # plain column sum is already the sum over valid rows.
        mean = jnp.sum(y, axis=0, keepdims=True) * inv_b
        row_ids = lax.broadcasted_iota(jnp.int32, y.shape, 0)
        centered = jnp.where(row_ids < n_valid_rows, y - mean, 0.0)
        var = jnp.sum(centered * centered, axis=0, keepdims=True) * inv_b
        o_ref[...] = ((y - mean) * lax.rsqrt(var + _BN_EPS)).astype(o_ref.dtype)


def _bn_apply_kernel(z_ref, o_ref):
    # Column-tiled BatchNorm over a pre-computed activation (two-pass fallback).
    y = z_ref[...].astype(jnp.float32)
    mean = jnp.mean(y, axis=0, keepdims=True)
    centered = y - mean
    var = jnp.mean(centered * centered, axis=0, keepdims=True)
    o_ref[...] = (centered * lax.rsqrt(var + _BN_EPS)).astype(o_ref.dtype)


def _bn_apply(z):
    B, N = z.shape
    tn = 128
    Np = _round_up(N, tn)
    zp = z if Np == N else jnp.pad(z, ((0, 0), (0, Np - N)))
    # TODO(synk): for extremely large batches where a (B, 128) column does not
    # fit VMEM, switch to a streaming two-pass (sum / sum-of-squares) BN.
    out = pl.pallas_call(
        _bn_apply_kernel,
        out_shape=jax.ShapeDtypeStruct((B, Np), z.dtype),
        grid_spec=pltpu.PrefetchScalarGridSpec(
            num_scalar_prefetch=0,
            grid=(Np // tn,),
            in_specs=[pl.BlockSpec((B, tn), lambda j: (0, j))],
            out_specs=pl.BlockSpec((B, tn), lambda j: (0, j)),
        ),
        compiler_params=pltpu.CompilerParams(
            dimension_semantics=("parallel",)),
    )(zp)
    return out[:, :N] if Np != N else out


def _bn_tiled_forward(x, weight):
    B, K = x.shape
    N = weight.shape[0]
    dtype = x.dtype
    itemsize = jnp.dtype(dtype).itemsize
    Mp = _round_up(B, 8)

    budget = 44 * 1024 * 1024
    choice = None
    for tn0, tk0 in ((256, 512), (128, 256), (128, 128)):
        tn = min(tn0, _round_up(N, 128))
        tk = min(tk0, _round_up(K, 128))
        est = (2 * (Mp * tk + tn * tk) * itemsize   # double-buffered inputs
               + 2 * Mp * tn * itemsize             # double-buffered output
               + Mp * tn * 4)                       # f32 accumulator
        if est <= budget:
            choice = (tn, tk, est)
            break

    if choice is None:
        # Batch too large for a resident (M, tn) column: two-pass fallback.
        return _bn_apply(_tiled_forward(x, weight, None))

    tn, tk, est = choice
    Np, Kp = _round_up(N, tn), _round_up(K, tk)

    xp = x if (Mp == B and Kp == K) else jnp.pad(x, ((0, Mp - B), (0, Kp - K)))
    wp = (weight if (Np == N and Kp == K)
          else jnp.pad(weight, ((0, Np - N), (0, Kp - K))))

    vmem_limit = min(max(est + est // 2, 16 * 1024 * 1024), 48 * 1024 * 1024)

    out = pl.pallas_call(
        functools.partial(_bn_fused_kernel, n_valid_rows=B),
        out_shape=jax.ShapeDtypeStruct((Mp, Np), dtype),
        grid_spec=pltpu.PrefetchScalarGridSpec(
            num_scalar_prefetch=0,
            grid=(Np // tn, Kp // tk),
            in_specs=[
                pl.BlockSpec((Mp, tk), lambda j, k: (0, k)),
                pl.BlockSpec((tn, tk), lambda j, k: (j, k)),
            ],
            out_specs=pl.BlockSpec((Mp, tn), lambda j, k: (0, j)),
            scratch_shapes=[pltpu.VMEM((Mp, tn), jnp.float32)],
        ),
        compiler_params=pltpu.CompilerParams(
            dimension_semantics=("parallel", "arbitrary"),
            vmem_limit_bytes=vmem_limit),
    )(xp, wp)

    return out[:B, :N] if (Mp != B or Np != N) else out


# --------------------------------------------------------------------------
# Public forward (dispatch) + PyTorch-style init.
# --------------------------------------------------------------------------

_SMALL_VMEM_BUDGET_BYTES = 4 * 1024 * 1024  # full-array single-block path


def linear_layer_forward(x, weight, bias=None, *, use_bias=True, use_bn=False):
    """Pallas forward for LinearLayer.

    x:      (B, in_features)
    weight: (out_features, in_features)   (PyTorch convention, no transpose)
    bias:   (out_features,) or None
    """
    B, K = x.shape
    N, K2 = weight.shape
    assert K == K2, "weight in_features mismatch"

    # As in the PyTorch module, the linear bias only exists when
    # use_bias and not use_bn.
    has_bias = use_bias and (not use_bn) and (bias is not None)

    total_bytes = (x.size + weight.size + B * N) * jnp.dtype(x.dtype).itemsize

    if use_bn:
        if total_bytes <= _SMALL_VMEM_BUDGET_BYTES:
            return _small_forward(x, weight, None, use_bn=True)
        return _bn_tiled_forward(x, weight)

    if total_bytes <= _SMALL_VMEM_BUDGET_BYTES:
        return _small_forward(x, weight, bias if has_bias else None,
                              use_bn=False)
    return _tiled_forward(x, weight, bias if has_bias else None)


def init_linear_params(key, in_features, out_features, use_bias=True):
    """PyTorch nn.Linear default init: U(-1/sqrt(in), 1/sqrt(in))."""
    kw, kb = jax.random.split(key)
    bound = 1.0 / (in_features ** 0.5)
    weight = jax.random.uniform(
        kw, (out_features, in_features), jnp.float32, -bound, bound)
    bias = (jax.random.uniform(kb, (out_features,), jnp.float32, -bound, bound)
            if use_bias else None)
    return weight, bias


if __name__ == "__main__":
    key = jax.random.PRNGKey(0)
    k_x, k_p, k_x2, k_p2 = jax.random.split(key, 4)

    # 1) Default config (use_bias=True, use_bn=False), tiny shape -> small path.
    batch, in_features, out_features = 8, 32, 64
    x = jax.random.normal(k_x, (batch, in_features), dtype=jnp.float32)
    weight, bias = init_linear_params(k_p, in_features, out_features,
                                      use_bias=True)
    y = jax.block_until_ready(linear_layer_forward(x, weight, bias))
    y_ref = x @ weight.T + bias
    assert jnp.allclose(y, y_ref, atol=1e-5, rtol=1e-5), "small-path mismatch"

    # 2) use_bn=True, tiny shape (linear bias disabled, training-mode stats).
    w2, _ = init_linear_params(k_p, in_features, out_features, use_bias=False)
    y_bn = jax.block_until_ready(
        linear_layer_forward(x, w2, None, use_bias=True, use_bn=True))
    z = x @ w2.T
    mu = z.mean(axis=0, keepdims=True)
    var = ((z - mu) ** 2).mean(axis=0, keepdims=True)
    y_bn_ref = (z - mu) / jnp.sqrt(var + _BN_EPS)
    assert jnp.allclose(y_bn, y_bn_ref, atol=1e-4, rtol=1e-4), "bn mismatch"

    # 3) Larger, non-tile-multiple shape -> tiled, padded, accumulator path.
    Bl, Kl, Nl = 1024, 768, 640
    xl = jax.random.normal(k_x2, (Bl, Kl), dtype=jnp.float32)
    wl, bl = init_linear_params(k_p2, Kl, Nl, use_bias=True)
    yl = jax.block_until_ready(linear_layer_forward(xl, wl, bl))
    yl_ref = xl @ wl.T + bl
    # Loose tolerance: kernel and XLA reference may use different default
    # f32 matmul precisions on the MXU; a tiling/padding bug would be O(1) off.
    assert jnp.allclose(yl, yl_ref, atol=2e-2, rtol=2e-2), "tiled-path mismatch"

    # 4) Larger use_bn=True shape -> fused matmul+BatchNorm path.
    wl2, _ = init_linear_params(k_p2, Kl, Nl, use_bias=False)
    yl_bn = jax.block_until_ready(
        linear_layer_forward(xl, wl2, None, use_bias=True, use_bn=True))
    zl = xl @ wl2.T
    mul = zl.mean(axis=0, keepdims=True)
    varl = ((zl - mul) ** 2).mean(axis=0, keepdims=True)
    yl_bn_ref = (zl - mul) / jnp.sqrt(varl + _BN_EPS)
    assert jnp.allclose(yl_bn, yl_bn_ref, atol=2e-2, rtol=2e-2), \
        "fused-bn mismatch"

    print("KERNEL_OK")
</pallas_src>

<mosaic_0001>
module attributes {stable_mosaic.version = 11 : i64} {
  func.func @_small_bias_kernel(%arg0: memref<8x32xf32, #tpu.memory_space<vmem>>, %arg1: memref<64x32xf32, #tpu.memory_space<vmem>>, %arg2: memref<1x64xf32, #tpu.memory_space<vmem>>, %arg3: memref<8x64xf32, #tpu.memory_space<vmem>>) attributes {dimension_semantics = [], scalar_prefetch = 0 : i64, scratch_operands = 0 : i64, tpu.core_type = #tpu.core_type<tc>} {
    %c0 = arith.constant 0 : index
    %c0_0 = arith.constant 0 : index
    %0 = vector.load %arg0[%c0, %c0_0] : memref<8x32xf32, #tpu.memory_space<vmem>>, vector<8x32xf32>
    %c0_1 = arith.constant 0 : index
    %c0_2 = arith.constant 0 : index
    %1 = vector.load %arg1[%c0_1, %c0_2] : memref<64x32xf32, #tpu.memory_space<vmem>>, vector<64x32xf32>
    %cst = arith.constant dense<0.000000e+00> : vector<8x64xf32>
    %2 = tpu.matmul %0, %1, %cst {dimension_numbers = #tpu.dot_dimension_numbers<[1], [1], [0], [0], [0, 0, 1, 0], [], []>} : vector<8x32xf32>, vector<64x32xf32>, vector<8x64xf32> -> vector<8x64xf32>
    %c0_3 = arith.constant 0 : index
    %c0_4 = arith.constant 0 : index
    %3 = vector.load %arg2[%c0_3, %c0_4] : memref<1x64xf32, #tpu.memory_space<vmem>>, vector<1x64xf32>
    %4 = vector.broadcast %3 : vector<1x64xf32> to vector<8x64xf32>
    %5 = arith.addf %2, %4 : vector<8x64xf32>
    %c0_5 = arith.constant 0 : index
    %c0_6 = arith.constant 0 : index
    %6 = vector.load %arg3[%c0_5, %c0_6] : memref<8x64xf32, #tpu.memory_space<vmem>>, vector<8x64xf32>
    tpu.vector_store %arg3[%c0_5, %c0_6], %5 {strides = array<i32>} : memref<8x64xf32, #tpu.memory_space<vmem>>, vector<8x64xf32>,
    return
  }
}

</mosaic_0001>

<bundles_post_ra>
// kernel: tpu_custom_call.1
= control target key start
LH: loop header
LB: loop body
LE: loop exit
PB: predicated region body
PF: predicated region fallthrough
CT: control target
= control target key end

     0   :  { %vm31_vm0 = vcmask 261120   ;;  %v208_v1 = vmov 0.0   ;;  %vm209_vm1 = vmmov 0   ;;  %s273_s0 = inlined_call_operand.vmem [shape: f32[8,32], index: 0, kind: input, shape index: {}]   ;;  %s274_s1 = inlined_call_operand.vmem [shape: f32[64,32], index: 1, kind: input, shape index: {}]   ;;  %s275_s2 = inlined_call_operand.vmem [shape: f32[1,64], index: 2, kind: input, shape index: {}]   ;;  %s276_s3 = inlined_call_operand.hbm [shape: f32[8,64], index: 3, kind: output, shape index: {}]  }
   0x1   :  { %v23_v0 = vld [vmem:[%s274_s1 + $0x38] sm:$0xff]  ;;  %164 = vmatprep.subr.mxu0 %v208_v1  ;;  %180 = vmatprep.mubr.msk.f32.mxu0 %vm209_vm1, %v208_v1  ;;  %v22_v2 = vld [vmem:[%s274_s1 + $0x30] sm:$0xff] }
   0x2   :  { %165 = vmatpush3.xpose.msk.msra.mxu0 %vm31_vm0, %v23_v0 }
   0x3   :  { %166 = vmatprep.subr.mxu0 %v208_v1 }
   0x4   :  { %8 = vsyncpa [#allocation3], 0  ;;  %v21_v3 = vld [vmem:[%s274_s1 + $0x28] sm:$0xff]  ;;  %v20_v4 = vld [vmem:[%s274_s1 + $0x20] sm:$0xff]  ;;  %s210_s5 = smov [#allocation2]   ;;  %vm129_vm2 = vcmask 523264  }
   0x5   :  { %v19_v5 = vld [vmem:[%s274_s1 + $0x18] sm:$0xff]  ;;  %v18_v6 = vld [vmem:[%s274_s1 + $0x10] sm:$0xff]  ;;  %v17_v7 = vld [vmem:[%s274_s1 + $0x8] sm:$0xff]  ;;  %s137_s6 = sshll.u32 %s210_s5, 4  ;;  %s138_s6 = int_to_ptr.vmem [resolvable:$true] %s137_s6 }
   0x6   :  { %167 = vmatpush3.xpose.msk.msra.mxu0 %vm31_vm0, %v22_v2  ;;  %v16_v8 = vld [vmem:[%s274_s1] sm:$0xff]  ;;  %s186_s1 = scalar_lea.vmem %s138_s6, 128  ;;  %p191_p1 = scmp.lt.s32.totalorder %s138_s6, %s138_s6 }
   0x7   :  { %168 = vmatprep.subr.mxu0 %v208_v1  ;;  %v15_v9 = vld [vmem:[%s273_s0] sm:$0xff]  ;;  %p187_p0 = scmp.ne.s32.totalorder %s138_s6, %s186_s1  ;;  %p192_p2 = scmp.lt.s32.totalorder %s186_s1, %s186_s1 }
   0x8   :  { %v145_v10 = vld [vmem:[%s275_s2] ss:$0 sm:$0xff] }
   0x9   :  { %p193_p3 = por %p192_p2, %p191_p1 }
   0xa   :  { %169 = vmatpush3.xpose.msk.msra.mxu0 %vm31_vm0, %v21_v3 }
   0xb   :  { %170 = vmatprep.subr.mxu0 %v208_v1  ;;  %p194_p4 = pnand %p193_p3, %p187_p0 }
   0xe   :  { %171 = vmatpush3.xpose.msk.msra.mxu0 %vm31_vm0, %v20_v4 }
   0xf   :  { %172 = vmatprep.subr.mxu0 %v208_v1 }
  0x12   :  { %173 = vmatpush3.xpose.msk.msra.mxu0 %vm31_vm0, %v19_v5 }
  0x13   :  { %174 = vmatprep.subr.mxu0 %v208_v1 }
  0x16   :  { %175 = vmatpush3.xpose.msk.msra.mxu0 %vm31_vm0, %v18_v6 }
  0x17   :  { %176 = vmatprep.subr.mxu0 %v208_v1 }
  0x1a   :  { %177 = vmatpush3.xpose.msk.msra.mxu0 %vm31_vm0, %v17_v7 }
  0x1b   :  { %178 = vmatprep.subr.mxu0 %v208_v1 }
  0x1e   :  { %179 = vmatpush3.xpose.msk.msra.mxu0 %vm31_vm0, %v16_v8 }
  0x21   :  { %181 = vmatmul.mubr.msk.f32.vlgmr.msra.gmra.mxu0 %vm31_vm0, %v15_v9 }
  0xe1   :  { %v125_v11 = vpop.f32.mrf.mxu0 }
  0xe2   :  { %v126_v12 = vadd.f32 %v145_v10, %v125_v11 }
  0xe3   :  { %v182_v13 = vpop.f32.mrf.mxu0 }
  0xe4   :  { %130 = vst.msk [vmem:[#allocation2] sm:$0xff] %vm129_vm2, %v126_v12 }
  0xe5   :  { %197 = shalt.err (!%p194_p4)
}
  0xe6   :  { %140 = dma.vmem_to_hbm [thread:$0]  %s138_s6, 128, %s276_s3, [#allocation3]  }
  0xe7   :  { %206 = dma.done.wait [#allocation3], 128  }
  0xe8   :  { %207 = vsyncadd [#allocation3], 4294967168 }
  0xe9   :  { %144 = vsyncpa [#allocation3], 1 }

</bundles_post_ra>
